<compile_context>
chip_gen: v7x
topology: tpu7x:2x2x1
jax: 0.10.0
libtpu: 0.0.40
codegen_flags: <defaults>
</compile_context>

<pallas_src>
import functools

import jax
import jax.numpy as jnp
from jax import lax
from jax.experimental import pallas as pl
from jax.experimental.pallas import tpu as pltpu

_MiB = 1024 * 1024


def _layernorm2d_kernel(x_ref, g_ref, b_ref, o_ref, *, eps):
    # x_ref: (bn, C, T)  -- C on sublanes, spatial tile on lanes.
    # g_ref / b_ref: (1, C, 1) f32, constant index_map -> VMEM-resident.
    x = x_ref[...].astype(jnp.float32)

    mean = jnp.mean(x, axis=1, keepdims=True)          # (bn, 1, T)
    xc = x - mean
    var = jnp.mean(xc * xc, axis=1, keepdims=True)     # two-pass: better numerics
    inv = lax.rsqrt(var + eps)

    y = xc * inv * g_ref[...] + b_ref[...]
    o_ref[...] = y.astype(o_ref.dtype)


def _device_kind():
    try:
        return jax.devices()[0].device_kind.lower()
    except Exception:
        return ""


def _gen_params(kind):
    """Per-generation tiling knobs.

    Returns (block_budget_bytes, lane_cap, vmem_limit_bytes, tc_per_chip).
    block_budget covers the double-buffered in+out blocks *and* the in-kernel
    f32 temporaries; vmem_limit leaves headroom above that.
    """
    if "v7" in kind:
        # 64 MiB VMEM per TC, ~3.2 TB/s HBM: big tiles matter most, but cap
        # the scoped limit well under physical and account for temporaries.
        return 28 * _MiB, 16384, 48 * _MiB, 2
    if "v6" in kind:
        # 128 MiB VMEM, ~1.4 TB/s HBM.
        return 24 * _MiB, 8192, 64 * _MiB, 1
    if "v5" in kind and ("lite" in kind or "v5e" in kind):
        # 128 MiB VMEM but only ~820 GB/s HBM: ~512-1024 lane tiles already
        # saturate; don't spend VMEM past that. Raise the 16 MiB scoped default.
        return 8 * _MiB, 1024, 32 * _MiB, 1
    # Unknown / other generations: conservative.
    return 8 * _MiB, 2048, 32 * _MiB, 1


def _pick_tiling(N, C, hw, itemsize, budget, lane_cap, tc_per_chip):
    """Choose (bn, t): batch-block size and lane tile.

    Per-lane per-image VMEM cost:
      - 2x double-buffered input block + 2x output block at the real itemsize
      - ~2 f32 temporaries per element inside the kernel (x_f32 copy + y)
    """
    per_lane = 4 * C * itemsize + 2 * C * 4
    max_lanes = max(int(budget // per_lane), 128)

    if hw <= max_lanes:
        # Full spatial extent: always a legal block, no padded tail block.
        t = hw
        # Batch-block small-spatial stages to amortize per-step overhead.
        bn = max(1, min(N, max_lanes // hw))
    else:
        t = min(max_lanes, lane_cap, hw)
        t = max((t // 128) * 128, 128)   # lane-dense: multiple of 128
        bn = 1

    # Multi-TensorCore parts (v7x): keep the grid at >= 2 steps so both TCs
    # get work from the "parallel" axes.
    if tc_per_chip > 1:
        steps = pl.cdiv(N, bn) * pl.cdiv(hw, t)
        if steps < 2:
            if N >= 2:
                bn = max(1, (N + 1) // 2)          # at least 2 batch blocks
            elif hw > 256 and t == hw:
                t = max(128, ((pl.cdiv(hw, 2) + 127) // 128) * 128)  # 2 lane blocks

    return int(bn), int(t)


def layernorm2d(x, gamma, beta, *, eps=1e-6):
    """x: (N, C, H, W); gamma, beta: (C,). Returns (N, C, H, W).

    Equivalent to permute(0,2,3,1) -> nn.LayerNorm(C, eps) -> permute(0,3,1,2),
    implemented transpose-free on the NCHW layout.
    """
    N, C, H, W = x.shape
    hw = H * W
    x3d = x.reshape(N, C, hw)                 # free, contiguous reshape

    # Pre-cast params to f32 once, pre-shaped for broadcast over (bn, C, T).
    g3d = gamma.astype(jnp.float32).reshape(1, C, 1)
    b3d = beta.astype(jnp.float32).reshape(1, C, 1)

    budget, lane_cap, vmem_limit, tc_per_chip = _gen_params(_device_kind())
    itemsize = jnp.dtype(x.dtype).itemsize
    bn, t = _pick_tiling(N, C, hw, itemsize, budget, lane_cap, tc_per_chip)

    grid = (pl.cdiv(N, bn), pl.cdiv(hw, t))   # partial tail blocks handled by Pallas

    kernel = functools.partial(_layernorm2d_kernel, eps=eps)

    out3d = pl.pallas_call(
        kernel,
        out_shape=jax.ShapeDtypeStruct((N, C, hw), x.dtype),
        grid_spec=pltpu.PrefetchScalarGridSpec(
            num_scalar_prefetch=0,
            grid=grid,
            in_specs=[
                pl.BlockSpec((bn, C, t), lambda n, j: (n, 0, j)),
                pl.BlockSpec((1, C, 1), lambda n, j: (0, 0, 0)),
                pl.BlockSpec((1, C, 1), lambda n, j: (0, 0, 0)),
            ],
            out_specs=pl.BlockSpec((bn, C, t), lambda n, j: (n, 0, j)),
        ),
        compiler_params=pltpu.CompilerParams(
            # Both grid axes are fully independent -> megacore sharding on v7x.
            dimension_semantics=("parallel", "parallel"),
            vmem_limit_bytes=vmem_limit,
        ),
    )(x3d, g3d, b3d)

    return out3d.reshape(N, C, H, W)


if __name__ == "__main__":
    key = jax.random.PRNGKey(0)
    N, C, H, W = 2, 4, 16, 16
    x = jax.random.normal(key, (N, C, H, W), dtype=jnp.float32)

    # nn.LayerNorm defaults: weight = ones, bias = zeros, shape (C,).
    gamma = jnp.ones((C,), dtype=jnp.float32)
    beta = jnp.zeros((C,), dtype=jnp.float32)

    out = layernorm2d(x, gamma, beta, eps=1e-6)
    out = jax.block_until_ready(out)

    # Pure-JAX reference (channel-dim LayerNorm on NCHW, same as the
    # permute -> LayerNorm(C) -> permute of the PyTorch module).
    mean = jnp.mean(x, axis=1, keepdims=True)
    var = jnp.mean((x - mean) ** 2, axis=1, keepdims=True)
    ref = (x - mean) * lax.rsqrt(var + 1e-6)
    ref = ref * gamma.reshape(1, C, 1, 1) + beta.reshape(1, C, 1, 1)
    assert jnp.max(jnp.abs(out - ref)) < 1e-4, "mismatch vs reference"

    print("KERNEL_OK")
</pallas_src>

<mosaic_0001>
module attributes {stable_mosaic.version = 11 : i64} {
  func.func @_layernorm2d_kernel(%arg0: i32, %arg1: i32, %arg2: memref<2x4x256xf32, #tpu.memory_space<vmem>>, %arg3: memref<1x4x1xf32, #tpu.memory_space<vmem>>, %arg4: memref<1x4x1xf32, #tpu.memory_space<vmem>>, %arg5: memref<2x4x256xf32, #tpu.memory_space<vmem>>) attributes {dimension_semantics = [#tpu.dimension_semantics<parallel>, #tpu.dimension_semantics<parallel>], iteration_bounds = array<i64: 1, 1>, scalar_prefetch = 0 : i64, scratch_operands = 0 : i64, tpu.core_type = #tpu.core_type<tc>, window_params = [{transform_indices = @transform_0, window_bounds = array<i64: 2, 4, 256>}, {pipeline_mode = #tpu.pipeline_mode<synchronous>, transform_indices = @transform_1, window_bounds = array<i64: 1, 4, 1>}, {pipeline_mode = #tpu.pipeline_mode<synchronous>, transform_indices = @transform_2, window_bounds = array<i64: 1, 4, 1>}, {transform_indices = @transform_3, window_bounds = array<i64: 2, 4, 256>}]} {
    %c0 = arith.constant 0 : index
    %c0_0 = arith.constant 0 : index
    %c0_1 = arith.constant 0 : index
    %0 = vector.load %arg2[%c0, %c0_0, %c0_1] : memref<2x4x256xf32, #tpu.memory_space<vmem>>, vector<2x4x256xf32>
    %cst = arith.constant dense<0.000000e+00> : vector<2x256xf32>
    %1 = vector.multi_reduction <add>, %0, %cst [1] : vector<2x4x256xf32> to vector<2x256xf32>
    %2 = vector.shape_cast %1 : vector<2x256xf32> to vector<2x1x256xf32>
    %cst_2 = arith.constant 4.000000e+00 : f32
    %3 = vector.broadcast %cst_2 : f32 to vector<2x1x256xf32>
    %4 = arith.divf %2, %3 : vector<2x1x256xf32>
    %5 = vector.broadcast %4 : vector<2x1x256xf32> to vector<2x4x256xf32>
    %6 = arith.subf %0, %5 : vector<2x4x256xf32>
    %7 = arith.mulf %6, %6 : vector<2x4x256xf32>
    %cst_3 = arith.constant dense<0.000000e+00> : vector<2x256xf32>
    %8 = vector.multi_reduction <add>, %7, %cst_3 [1] : vector<2x4x256xf32> to vector<2x256xf32>
    %9 = vector.shape_cast %8 : vector<2x256xf32> to vector<2x1x256xf32>
    %cst_4 = arith.constant 4.000000e+00 : f32
    %10 = vector.broadcast %cst_4 : f32 to vector<2x1x256xf32>
    %11 = arith.divf %9, %10 : vector<2x1x256xf32>
    %cst_5 = arith.constant 9.99999997E-7 : f32
    %12 = vector.broadcast %cst_5 : f32 to vector<2x1x256xf32>
    %13 = arith.addf %11, %12 : vector<2x1x256xf32>
    %14 = math.rsqrt %13 : vector<2x1x256xf32>
    %15 = vector.broadcast %14 : vector<2x1x256xf32> to vector<2x4x256xf32>
    %16 = arith.mulf %6, %15 : vector<2x4x256xf32>
    %c0_6 = arith.constant 0 : index
    %c0_7 = arith.constant 0 : index
    %c0_8 = arith.constant 0 : index
    %17 = vector.load %arg3[%c0_6, %c0_7, %c0_8] : memref<1x4x1xf32, #tpu.memory_space<vmem>>, vector<1x4x1xf32>
    %18 = vector.broadcast %17 : vector<1x4x1xf32> to vector<2x4x256xf32>
    %19 = arith.mulf %16, %18 : vector<2x4x256xf32>
    %c0_9 = arith.constant 0 : index
    %c0_10 = arith.constant 0 : index
    %c0_11 = arith.constant 0 : index
    %20 = vector.load %arg4[%c0_9, %c0_10, %c0_11] : memref<1x4x1xf32, #tpu.memory_space<vmem>>, vector<1x4x1xf32>
    %21 = vector.broadcast %20 : vector<1x4x1xf32> to vector<2x4x256xf32>
    %22 = arith.addf %19, %21 : vector<2x4x256xf32>
    %c0_12 = arith.constant 0 : index
    %c0_13 = arith.constant 0 : index
    %c0_14 = arith.constant 0 : index
    %23 = vector.load %arg5[%c0_12, %c0_13, %c0_14] : memref<2x4x256xf32, #tpu.memory_space<vmem>>, vector<2x4x256xf32>
    tpu.vector_store %arg5[%c0_12, %c0_13, %c0_14], %22 {strides = array<i32>} : memref<2x4x256xf32, #tpu.memory_space<vmem>>, vector<2x4x256xf32>,
    return
  }
  func.func @transform_0(%arg0: i32, %arg1: i32) -> (i32, i32, i32) {
    %c0_i32 = arith.constant 0 : i32
    %c0_i32_0 = arith.constant 0 : i32
    return %arg0, %c0_i32, %arg1 : i32, i32, i32
  }
  func.func @transform_1(%arg0: i32, %arg1: i32) -> (i32, i32, i32) {
    %c0_i32 = arith.constant 0 : i32
    %c0_i32_0 = arith.constant 0 : i32
    %c0_i32_1 = arith.constant 0 : i32
    %c0_i32_2 = arith.constant 0 : i32
    return %c0_i32, %c0_i32_0, %c0_i32_1 : i32, i32, i32
  }
  func.func @transform_2(%arg0: i32, %arg1: i32) -> (i32, i32, i32) {
    %c0_i32 = arith.constant 0 : i32
    %c0_i32_0 = arith.constant 0 : i32
    %c0_i32_1 = arith.constant 0 : i32
    %c0_i32_2 = arith.constant 0 : i32
    return %c0_i32, %c0_i32_0, %c0_i32_1 : i32, i32, i32
  }
  func.func @transform_3(%arg0: i32, %arg1: i32) -> (i32, i32, i32) {
    %c0_i32 = arith.constant 0 : i32
    %c0_i32_0 = arith.constant 0 : i32
    return %arg0, %c0_i32, %arg1 : i32, i32, i32
  }
}

</mosaic_0001>

<bundles_post_ra>
// kernel: tpu_custom_call.1
= control target key start
LH: loop header
LB: loop body
LE: loop exit
PB: predicated region body
PF: predicated region fallthrough
CT: control target
= control target key end

     0   :  { %8 = vsyncpa [#allocation3], 0  ;;  %s323_s0 = inlined_call_operand.hbm [shape: f32[2,4,256], index: 0, kind: input, shape index: {}]   ;;  %s324_s1 = inlined_call_operand.vmem [shape: f32[1,4,1], index: 1, kind: input, shape index: {}]   ;;  %s325_s2 = inlined_call_operand.vmem [shape: f32[1,4,1], index: 2, kind: input, shape index: {}]   ;;  %s326_s3 = inlined_call_operand.hbm [shape: f32[2,4,256], index: 3, kind: output, shape index: {}]  }
   0x1   :  { %9 = vsyncpa [#allocation4], 0  ;;  %s253_s12 = smov [#allocation2]   ;;  %s205_s16 = scalar_lea.hbm %s323_s0, 256 }
   0x2   :  { %s15_s13 = sshll.u32 %s253_s12, 4  ;;  %p206_p0 = scmp.ne.s32.totalorder %s323_s0, %s205_s16  ;;  %s16_s13 = int_to_ptr.vmem [resolvable:$true] %s15_s13 }
   0x3   :  { %p209_p1 = scmp.lt.u32.totalorder %s205_s16, %s323_s0 }
   0x5   :  { %p211_p2 = pnand %p209_p1, %p206_p0 }
   0x7   :  { %214 = shalt.err (!%p211_p2)
}
   0x8   :  { %s215_s21 = scalar_lea.vmem %s16_s13, 256  ;;  %p220_p4 = scmp.lt.s32.totalorder %s16_s13, %s16_s13 }
   0x9   :  { %p216_p3 = scmp.ne.s32.totalorder %s16_s13, %s215_s21  ;;  %p221_p5 = scmp.lt.s32.totalorder %s215_s21, %s215_s21 }
   0xb   :  { %p222_p6 = por %p221_p5, %p220_p4 }
   0xd   :  { %p223_p7 = pnand %p222_p6, %p216_p3 }
   0xf   :  { %226 = shalt.err (!%p223_p7)
}
  0x10   :  { %s254_s22 = smov 128   ;;  %s255_s23 = smov 8  }
  0x11   :  { %21 = dma.hbm_to_vmem [thread:$0]  %s323_s0, 256, %s16_s13, [#allocation3], %s254_s22, %s254_s22, %s255_s23  }
  0x12   :  { %249 = dma.done.wait [#allocation3], 256  }
  0x13   :  { %250 = vsyncadd [#allocation3], 4294967040  ;;  %v256_v0 = vmov 0   ;;  %v139_v1 = vld [vmem:[%s324_s1] sm:$0xf]  ;;  %v30_v4 = vld [vmem:[#allocation2 + $0x8] sm:$0xff] }
  0x14   :  { %194 = vset.pattern.permute.xlu0 %v256_v0  ;;  %v154_v2 = vld [vmem:[%s325_s2] sm:$0xf]  ;;  %vm37_vm0 = vcmask 1043456   ;;  %v34_v6 = vcombine.high %v30_v4, %v30_v4  ;;  %s258_s0 = smov [#allocation5]  }
  0x15   :  { %142 = vperm.xlu0 %194, %v139_v1   ;;  %v29_v3 = vld [vmem:[#allocation2] sm:$0xff]  ;;  %v52_v9 = vsel %vm37_vm0, %v30_v4, 0.0  ;;  %s176_s1 = sshll.u32 %s258_s0, 4  ;;  %s177_s1 = int_to_ptr.vmem [resolvable:$true] %s176_s1 }
  0x16   :  { %v33_v5 = vcombine.high %v29_v3, %v29_v3  ;;  %v38_v7 = vsel %vm37_vm0, %v29_v3, 0.0  ;;  %v59_v10 = vsel %vm37_vm0, %v34_v6, 0.0  ;;  %v53_v13 = vrot.slane %v52_v9, 4  ;;  %s227_s2 = scalar_lea.vmem %s177_s1, 256  ;;  %p232_p9 = scmp.lt.s32.totalorder %s177_s1, %s177_s1 }
  0x17   :  { %v39_v11 = vrot.slane %v38_v7, 4  ;;  %v60_v14 = vrot.slane %v59_v10, 4  ;;  %p228_p8 = scmp.ne.s32.totalorder %s177_s1, %s227_s2  ;;  %p233_p10 = scmp.lt.s32.totalorder %s227_s2, %s227_s2 }
  0x18   :  { %v45_v8 = vsel %vm37_vm0, %v33_v5, 0.0  ;;  %v54_v17 = vadd.f32 %v53_v13, %v52_v9 }
  0x19   :  { %157 = vperm.xlu0 %194, %v154_v2   ;;  %v46_v12 = vrot.slane %v45_v8, 4  ;;  %v40_v15 = vadd.f32 %v39_v11, %v38_v7  ;;  %v61_v18 = vadd.f32 %v60_v14, %v59_v10  ;;  %p234_p11 = por %p233_p10, %p232_p9 }
  0x1a   :  { %v55_v21 = vrot.slane %v54_v17, 2 }
  0x1b   :  { %v47_v16 = vadd.f32 %v46_v12, %v45_v8  ;;  %v41_v19 = vrot.slane %v40_v15, 2  ;;  %v62_v22 = vrot.slane %v61_v18, 2  ;;  %p235_p12 = pnand %p234_p11, %p228_p8 }
  0x1c   :  { %v56_v25 = vadd.f32 %v55_v21, %v54_v17  ;;  %v147_v21 = vlaneseq }
  0x1d   :  { %v48_v20 = vrot.slane %v47_v16, 2  ;;  %v42_v23 = vadd.f32 %v41_v19, %v40_v15  ;;  %v63_v26 = vadd.f32 %v62_v22, %v61_v18  ;;  %v257_v19 = vmov 839922192  }
  0x1e   :  { %v57_v29 = vrot.slane %v56_v25, 1 }
  0x1f   :  { %v49_v24 = vadd.f32 %v48_v20, %v47_v16  ;;  %v43_v27 = vrot.slane %v42_v23, 1  ;;  %v64_v30 = vrot.slane %v63_v26, 1  ;;  %v145_v20 = vunpack.c.l.s4 %v257_v19 }
  0x20   :  { %v58_v33 = vadd.f32 %v57_v29, %v56_v25 }
  0x21   :  { %v50_v28 = vrot.slane %v49_v24, 1  ;;  %v44_v31 = vadd.f32 %v43_v27, %v42_v23  ;;  %v65_v34 = vadd.f32 %v64_v30, %v63_v26  ;;  %v146_v25 = vunpack.c.0.s8 %v145_v20 }
  0x22   :  { %v69_v37 = vmul.f32 0.25, %v58_v33  ;;  %v148_v26 = vshrl.u32 %v147_v21, 7 }
  0x23   :  { %v51_v32 = vadd.f32 %v50_v28, %v49_v24  ;;  %v67_v35 = vmul.f32 0.25, %v44_v31  ;;  %v70_v38 = vmul.f32 0.25, %v65_v34 }
  0x24   :  { %v149_v28 = vsub.s32 %v146_v25, %v148_v26 }
  0x25   :  { %v68_v36 = vmul.f32 0.25, %v51_v32  ;;  %v76_v40 = vcombine.low %v69_v37, %v70_v38 }
  0x27   :  { %v75_v39 = vcombine.low %v67_v35, %v68_v36  ;;  %v80_v42 = vsub.f32 %v30_v4, %v76_v40 }
  0x29   :  { %v79_v41 = vsub.f32 %v29_v3, %v75_v39  ;;  %v82_v44 = vmul.f32 %v80_v42, %v80_v42 }
  0x2b   :  { %v81_v43 = vmul.f32 %v79_v41, %v79_v41  ;;  %v86_v46 = vcombine.high %v82_v44, %v82_v44  ;;  %v103_v48 = vsel %vm37_vm0, %v82_v44, 0.0 }
  0x2c   :  { %v104_v52 = vrot.slane %v103_v48, 4 }
  0x2d   :  { %v85_v45 = vcombine.high %v81_v43, %v81_v43  ;;  %v89_v47 = vsel %vm37_vm0, %v81_v43, 0.0  ;;  %v110_v51 = vsel %vm37_vm0, %v86_v46, 0.0 }
  0x2e   :  { %v90_v50 = vrot.slane %v89_v47, 4  ;;  %v111_v54 = vrot.slane %v110_v51, 4  ;;  %v105_v56 = vadd.f32 %v104_v52, %v103_v48 }
  0x2f   :  { %v96_v49 = vsel %vm37_vm0, %v85_v45, 0.0 }
  0x30   :  { %v97_v53 = vrot.slane %v96_v49, 4  ;;  %v91_v55 = vadd.f32 %v90_v50, %v89_v47  ;;  %v112_v58 = vadd.f32 %v111_v54, %v110_v51  ;;  %v106_v60 = vrot.slane %v105_v56, 2 }
  0x32   :  { %v98_v57 = vadd.f32 %v97_v53, %v96_v49  ;;  %v92_v59 = vrot.slane %v91_v55, 2  ;;  %v113_v62 = vrot.slane %v112_v58, 2  ;;  %v107_v0 = vadd.f32 %v106_v60, %v105_v56 }
  0x34   :  { %v99_v61 = vrot.slane %v98_v57, 2  ;;  %v93_v63 = vadd.f32 %v92_v59, %v91_v55  ;;  %v114_v2 = vadd.f32 %v113_v62, %v112_v58  ;;  %v108_v4 = vrot.slane %v107_v0, 1 }
  0x36   :  { %v100_v1 = vadd.f32 %v99_v61, %v98_v57  ;;  %v94_v3 = vrot.slane %v93_v63, 1  ;;  %v115_v6 = vrot.slane %v114_v2, 1  ;;  %v109_v8 = vadd.f32 %v108_v4, %v107_v0 }
  0x38   :  { %v101_v5 = vrot.slane %v100_v1, 1  ;;  %v95_v7 = vadd.f32 %v94_v3, %v93_v63  ;;  %v116_v10 = vadd.f32 %v115_v6, %v114_v2  ;;  %v119_v12 = vmul.f32 0.25, %v109_v8 }
  0x3a   :  { %v102_v9 = vadd.f32 %v101_v5, %v100_v1  ;;  %v117_v11 = vmul.f32 0.25, %v95_v7  ;;  %v120_v14 = vmul.f32 0.25, %v116_v10  ;;  %v123_v16 = vadd.f32 1e-06, %v119_v12 }
  0x3c   :  { %v118_v13 = vmul.f32 0.25, %v102_v9  ;;  %v121_v15 = vadd.f32 1e-06, %v117_v11  ;;  %v124_v18 = vadd.f32 1e-06, %v120_v14 }
  0x3e   :  { %v122_v17 = vadd.f32 1e-06, %v118_v13  ;;  %197 = vrsqrt.f32 %v121_v15 }
  0x3f   :  { %199 = vrsqrt.f32 %v123_v16 }
  0x40   :  { %201 = vrsqrt.f32 %v122_v17 }
  0x41   :  { %203 = vrsqrt.f32 %v124_v18 }
  0x48   :  { %v198_v22 = vpop.eup %197 }
  0x49   :  { %v200_v23 = vpop.eup %199 }
  0x4a   :  { %v202_v24 = vpop.eup %201 }
  0x4b   :  { %v204_v27 = vpop.eup %203  ;;  %v133_v29 = vcombine.low %v198_v22, %v202_v24 }
  0x4c   :  { %v134_v30 = vcombine.low %v200_v23, %v204_v27 }
  0x4d   :  { %v137_v32 = vmul.f32 %v133_v29, %v79_v41 }
  0x4e   :  { %v138_v33 = vmul.f32 %v134_v30, %v80_v42 }
  0x94   :  { %v143_v31 = vpop.permute.xlu0 %142 }
  0x95   :  { %v150_v34 = vrot.slane %v143_v31, %v149_v28 }
  0x97   :  { %v152_v36 = vmul.f32 %v150_v34, %v137_v32  ;;  %v153_v37 = vmul.f32 %v150_v34, %v138_v33 }
  0x98   :  { %v158_v35 = vpop.permute.xlu0 %157 }
  0x99   :  { %v165_v38 = vrot.slane %v158_v35, %v149_v28 }
  0x9b   :  { %v167_v39 = vadd.f32 %v165_v38, %v152_v36  ;;  %v168_v40 = vadd.f32 %v165_v38, %v153_v37 }
  0x9d   :  { %169 = vst [vmem:[#allocation5] sm:$0xff] %v167_v39  ;;  %170 = vst [vmem:[#allocation5 + $0x8] sm:$0xff] %v168_v40 }
  0x9e   :  { %238 = shalt.err (!%p235_p12)
}
  0x9f   :  { %s239_s5 = scalar_lea.hbm %s326_s3, 256 }
  0xa0   :  { %p240_p13 = scmp.ne.s32.totalorder %s326_s3, %s239_s5  ;;  %p243_p0 = scmp.lt.u32.totalorder %s239_s5, %s326_s3 }
  0xa2   :  { %p245_p1 = pnand %p243_p0, %p240_p13 }
  0xa4   :  { %248 = shalt.err (!%p245_p1)
}
  0xa5   :  { %182 = dma.vmem_to_hbm [thread:$0]  %s177_s1, 256, %s326_s3, [#allocation4], %s254_s22, %s254_s22, %s255_s23  }
  0xa6   :  { %251 = dma.done.wait [#allocation4], 256  }
  0xa7   :  { %252 = vsyncadd [#allocation4], 4294967040 }
  0xa8   :  { %186 = vsyncpa [#allocation3], 1 }
  0xa9   :  { %187 = vsyncpa [#allocation4], 1 }

</bundles_post_ra>
